<compile_context>
chip_gen: v7x
topology: tpu7x:2x2x1
jax: 0.10.0
libtpu: 0.0.40
codegen_flags: <defaults>
</compile_context>

<pallas_src>
import jax
import jax.numpy as jnp
from jax import lax
from jax.experimental import pallas as pl
from jax.experimental.pallas import tpu as pltpu


def _round_up(n, m):
    return ((n + m - 1) // m) * m


def _cdiv(a, b):
    return -(-a // b)


def _stable_sigmoid(z):
    """Exact, numerically stable sigmoid (no overflow, no approx reciprocal)."""
    e = jnp.exp(-jnp.abs(z))
    return jnp.where(z >= 0, 1.0 / (1.0 + e), e / (1.0 + e))


def mlp_kernel(x_ref, w1_ref, b1_ref, w2_ref, b2_ref,
               w3_ref, b3_ref, w4_ref, b4_ref, o_ref):
    """Fused 4-layer MLP on one (batch_tile, D) tile of x.

    Activations are kept TRANSPOSED -- (features, batch_tile) -- so the batch
    rides the 128-lane axis: hidden vregs are lane-dense and the (1, tile)
    result is written with full-width unmasked vector stores.
    """
    cd = w1_ref.dtype                      # compute dtype (bf16 by default)
    x = x_ref[...].astype(cd)              # (tile, D); cast is free (mem-bound)

    # Layer 1: transposed-operand MXU contraction  w1 @ x^T -> (64, tile).
    z1 = lax.dot_general(w1_ref[...], x, (((1,), (1,)), ((), ())),
                         preferred_element_type=jnp.float32) + b1_ref[...]
    a1 = jnp.maximum(z1, 0.0).astype(cd)                            # (64, tile)

    z2 = jnp.dot(w2_ref[...], a1,
                 preferred_element_type=jnp.float32) + b2_ref[...]  # (32, tile)
    a2 = jnp.maximum(z2, 0.0).astype(cd)

    z3 = jnp.dot(w3_ref[...], a2,
                 preferred_element_type=jnp.float32) + b3_ref[...]  # (16, tile)
    a3 = jnp.maximum(z3, 0.0).astype(cd)

    z4 = jnp.dot(w4_ref[...], a3,
                 preferred_element_type=jnp.float32) + b4_ref[...]  # (1, tile)

    o_ref[...] = _stable_sigmoid(z4)                                # (1, tile)


def _pick_tile(B, batch_tile):
    """Largest lane-aligned tile <= batch_tile, preferring an even, >=2 grid
    step count so v7x's two TensorCores both get work (negligible effect on
    the single-TC v5e/v6e)."""
    tile = min(batch_tile, _round_up(B, 128))
    steps = _cdiv(B, tile)
    if tile > 128 and steps % 2 == 1:
        alt = _round_up(_cdiv(B, steps + 1), 128)
        if alt >= 128:
            tile = alt
    return tile


def net_forward(x, params, *, batch_tile=16384, compute_dtype=jnp.bfloat16):
    """x: (B, input_size), f32 or bf16 (bf16 input halves the HBM stream).

    params: PyTorch-layout weights w{i} of shape (out, in), biases b{i} of
    shape (out, 1) (column form so they broadcast along the lane/batch axis).
    """
    B, D = x.shape
    batch_tile = max(128, _round_up(batch_tile, 128))
    # 16384-row default: (tile,D) f32 block is lane-padded to 128 lanes ->
    # 8 MiB, x2 double-buffer = 16 MiB, safely inside v7x's scoped VMEM.
    tile = _pick_tile(B, batch_tile)
    B_pad = _round_up(B, tile)
    if B_pad != B:
        x = jnp.pad(x, ((0, B_pad - B), (0, 0)))

    cd = jnp.dtype(compute_dtype)
    w = {i: params[f"w{i}"].astype(cd) for i in range(1, 5)}      # MXU operands
    b = {i: params[f"b{i}"].astype(jnp.float32) for i in range(1, 5)}

    def resident_spec(shape):
        n = len(shape)
        # Constant index map: fetched once, stays VMEM-resident across steps.
        return pl.BlockSpec(shape, lambda i, n=n: (0,) * n)

    grid = (B_pad // tile,)

    # Advisory cost estimate for XLA's scheduler around this mem-bound call.
    flops = 2 * B_pad * (D * 64 + 64 * 32 + 32 * 16 + 16 * 1)
    bytes_accessed = (
        B_pad * D * x.dtype.itemsize                      # x stream
        + B_pad * 4                                       # (1, B_pad) f32 out
        + sum(int(a.size) * a.dtype.itemsize
              for a in (*w.values(), *b.values()))        # resident constants
    )
    cost = pl.CostEstimate(flops=flops, transcendentals=B_pad,
                           bytes_accessed=bytes_accessed)

    out = pl.pallas_call(
        mlp_kernel,
        out_shape=jax.ShapeDtypeStruct((1, B_pad), jnp.float32),
        grid_spec=pltpu.PrefetchScalarGridSpec(
            num_scalar_prefetch=0,
            grid=grid,
            in_specs=[
                pl.BlockSpec((tile, D), lambda i: (i, 0)),        # x: batch-tiled
                resident_spec(w[1].shape), resident_spec(b[1].shape),
                resident_spec(w[2].shape), resident_spec(b[2].shape),
                resident_spec(w[3].shape), resident_spec(b[3].shape),
                resident_spec(w[4].shape), resident_spec(b[4].shape),
            ],
            # Lane-dense output: batch on the 128-lane axis, (1, tile) slabs.
            out_specs=pl.BlockSpec((1, tile), lambda i: (0, i)),
        ),
        compiler_params=pltpu.CompilerParams(
            dimension_semantics=("parallel",)),   # batch steps -> both v7x TCs
        cost_estimate=cost,
    )(x, w[1], b[1], w[2], b[2], w[3], b[3], w[4], b[4])

    return out.reshape(B_pad, 1)[:B]


def init_params(key, input_size):
    """Deterministic init matching PyTorch nn.Linear layer shapes.

    nn.Linear(in, out): weight (out, in), bias (out,).  Bias is stored as an
    (out, 1) column so it broadcasts along the lane (batch) axis in-kernel.
    """
    sizes = [(input_size, 64), (64, 32), (32, 16), (16, 1)]
    params = {}
    for idx, (fan_in, fan_out) in enumerate(sizes, start=1):
        key, kw, kb = jax.random.split(key, 3)
        bound = 1.0 / jnp.sqrt(fan_in)
        params[f"w{idx}"] = jax.random.uniform(
            kw, (fan_out, fan_in), jnp.float32, -bound, bound)
        params[f"b{idx}"] = jax.random.uniform(
            kb, (fan_out, 1), jnp.float32, -bound, bound)
    return params


def reference_forward_f32(x, params):
    """Plain row-major f32 math, mirroring the PyTorch module directly."""
    a = x.astype(jnp.float32)
    for i in range(1, 4):
        a = jnp.maximum(a @ params[f"w{i}"].T + params[f"b{i}"][:, 0], 0.0)
    z4 = a @ params["w4"].T + params["b4"][:, 0]
    return _stable_sigmoid(z4)


def reference_forward_quantized(x, params, compute_dtype=jnp.bfloat16):
    """Mirrors the kernel's numerics exactly (same bf16 operands, f32 accum,
    transposed orientation) -> tight-tolerance oracle."""
    cd = jnp.dtype(compute_dtype)
    xq = x.astype(cd)
    z1 = lax.dot_general(params["w1"].astype(cd), xq, (((1,), (1,)), ((), ())),
                         preferred_element_type=jnp.float32) + params["b1"]
    a1 = jnp.maximum(z1, 0.0).astype(cd)
    z2 = jnp.dot(params["w2"].astype(cd), a1,
                 preferred_element_type=jnp.float32) + params["b2"]
    a2 = jnp.maximum(z2, 0.0).astype(cd)
    z3 = jnp.dot(params["w3"].astype(cd), a2,
                 preferred_element_type=jnp.float32) + params["b3"]
    a3 = jnp.maximum(z3, 0.0).astype(cd)
    z4 = jnp.dot(params["w4"].astype(cd), a3,
                 preferred_element_type=jnp.float32) + params["b4"]
    return _stable_sigmoid(z4).T


if __name__ == "__main__":
    key = jax.random.PRNGKey(0)
    key, kx, kp, kx2 = jax.random.split(key, 4)

    batch, input_size = 8, 32
    params = init_params(kp, input_size)

    # Check 1: small f32 batch (single 128-row grid step).
    x = jax.random.normal(kx, (batch, input_size), jnp.float32)
    out = jax.block_until_ready(net_forward(x, params))
    assert out.shape == (batch, 1)
    # Tight: vs a reference doing the identical bf16-operand / f32-accum math.
    assert jnp.allclose(out, reference_forward_quantized(x, params),
                        atol=2e-3, rtol=2e-3)
    # Loose: vs the plain f32 PyTorch math (bf16 operand quantization budget).
    assert jnp.allclose(out, reference_forward_f32(x, params),
                        atol=1e-2, rtol=1e-2)

    # Check 2: ragged batch, bf16-streamed x, even 2-step "parallel" grid.
    batch2 = 2500
    x2 = jax.random.normal(kx2, (batch2, input_size),
                           jnp.float32).astype(jnp.bfloat16)
    out2 = jax.block_until_ready(net_forward(x2, params))
    assert out2.shape == (batch2, 1)
    assert jnp.allclose(out2, reference_forward_quantized(x2, params),
                        atol=2e-3, rtol=2e-3)
    assert jnp.allclose(out2, reference_forward_f32(x2, params),
                        atol=1e-2, rtol=1e-2)

    print("KERNEL_OK")
</pallas_src>

<mosaic_0001>
module attributes {stable_mosaic.version = 11 : i64} {
  func.func @mlp_kernel(%arg0: i32, %arg1: memref<128x32xf32, #tpu.memory_space<vmem>>, %arg2: memref<64x32xbf16, #tpu.memory_space<vmem>>, %arg3: memref<64x1xf32, #tpu.memory_space<vmem>>, %arg4: memref<32x64xbf16, #tpu.memory_space<vmem>>, %arg5: memref<32x1xf32, #tpu.memory_space<vmem>>, %arg6: memref<16x32xbf16, #tpu.memory_space<vmem>>, %arg7: memref<16x1xf32, #tpu.memory_space<vmem>>, %arg8: memref<1x16xbf16, #tpu.memory_space<vmem>>, %arg9: memref<1x1xf32, #tpu.memory_space<vmem>>, %arg10: memref<1x128xf32, #tpu.memory_space<vmem>>) attributes {dimension_semantics = [#tpu.dimension_semantics<parallel>], iteration_bounds = array<i64: 1>, scalar_prefetch = 0 : i64, scratch_operands = 0 : i64, tpu.core_type = #tpu.core_type<tc>, window_params = [{transform_indices = @transform_0, window_bounds = array<i64: 128, 32>}, {pipeline_mode = #tpu.pipeline_mode<synchronous>, transform_indices = @transform_1, window_bounds = array<i64: 64, 32>}, {pipeline_mode = #tpu.pipeline_mode<synchronous>, transform_indices = @transform_2, window_bounds = array<i64: 64, 1>}, {pipeline_mode = #tpu.pipeline_mode<synchronous>, transform_indices = @transform_3, window_bounds = array<i64: 32, 64>}, {pipeline_mode = #tpu.pipeline_mode<synchronous>, transform_indices = @transform_4, window_bounds = array<i64: 32, 1>}, {pipeline_mode = #tpu.pipeline_mode<synchronous>, transform_indices = @transform_5, window_bounds = array<i64: 16, 32>}, {pipeline_mode = #tpu.pipeline_mode<synchronous>, transform_indices = @transform_6, window_bounds = array<i64: 16, 1>}, {pipeline_mode = #tpu.pipeline_mode<synchronous>, transform_indices = @transform_7, window_bounds = array<i64: 1, 16>}, {pipeline_mode = #tpu.pipeline_mode<synchronous>, transform_indices = @transform_8, window_bounds = array<i64: 1, 1>}, {transform_indices = @transform_9, window_bounds = array<i64: 1, 128>}]} {
    %c0 = arith.constant 0 : index
    %c0_0 = arith.constant 0 : index
    %0 = vector.load %arg1[%c0, %c0_0] : memref<128x32xf32, #tpu.memory_space<vmem>>, vector<128x32xf32>
    %1 = arith.truncf %0 : vector<128x32xf32> to vector<128x32xbf16>
    %c0_1 = arith.constant 0 : index
    %c0_2 = arith.constant 0 : index
    %2 = vector.load %arg2[%c0_1, %c0_2] : memref<64x32xbf16, #tpu.memory_space<vmem>>, vector<64x32xbf16>
    %cst = arith.constant dense<0.000000e+00> : vector<64x128xf32>
    %3 = tpu.matmul %2, %1, %cst {dimension_numbers = #tpu.dot_dimension_numbers<[1], [1], [0], [0], [0, 0, 1, 0], [], []>} : vector<64x32xbf16>, vector<128x32xbf16>, vector<64x128xf32> -> vector<64x128xf32>
    %c0_3 = arith.constant 0 : index
    %c0_4 = arith.constant 0 : index
    %4 = vector.load %arg3[%c0_3, %c0_4] : memref<64x1xf32, #tpu.memory_space<vmem>>, vector<64x1xf32>
    %5 = vector.broadcast %4 : vector<64x1xf32> to vector<64x128xf32>
    %6 = arith.addf %3, %5 : vector<64x128xf32>
    %cst_5 = arith.constant 0.000000e+00 : f32
    %7 = vector.broadcast %cst_5 : f32 to vector<64x128xf32>
    %8 = arith.maximumf %6, %7 : vector<64x128xf32>
    %9 = arith.truncf %8 : vector<64x128xf32> to vector<64x128xbf16>
    %c0_6 = arith.constant 0 : index
    %c0_7 = arith.constant 0 : index
    %10 = vector.load %arg4[%c0_6, %c0_7] : memref<32x64xbf16, #tpu.memory_space<vmem>>, vector<32x64xbf16>
    %cst_8 = arith.constant dense<0.000000e+00> : vector<32x128xf32>
    %11 = tpu.matmul %10, %9, %cst_8 {dimension_numbers = #tpu.dot_dimension_numbers<[1], [0], [0], [1], [0, 0, 1, 1], [], []>} : vector<32x64xbf16>, vector<64x128xbf16>, vector<32x128xf32> -> vector<32x128xf32>
    %c0_9 = arith.constant 0 : index
    %c0_10 = arith.constant 0 : index
    %12 = vector.load %arg5[%c0_9, %c0_10] : memref<32x1xf32, #tpu.memory_space<vmem>>, vector<32x1xf32>
    %13 = vector.broadcast %12 : vector<32x1xf32> to vector<32x128xf32>
    %14 = arith.addf %11, %13 : vector<32x128xf32>
    %cst_11 = arith.constant 0.000000e+00 : f32
    %15 = vector.broadcast %cst_11 : f32 to vector<32x128xf32>
    %16 = arith.maximumf %14, %15 : vector<32x128xf32>
    %17 = arith.truncf %16 : vector<32x128xf32> to vector<32x128xbf16>
    %c0_12 = arith.constant 0 : index
    %c0_13 = arith.constant 0 : index
    %18 = vector.load %arg6[%c0_12, %c0_13] : memref<16x32xbf16, #tpu.memory_space<vmem>>, vector<16x32xbf16>
    %cst_14 = arith.constant dense<0.000000e+00> : vector<16x128xf32>
    %19 = tpu.matmul %18, %17, %cst_14 {dimension_numbers = #tpu.dot_dimension_numbers<[1], [0], [0], [1], [0, 0, 1, 1], [], []>} : vector<16x32xbf16>, vector<32x128xbf16>, vector<16x128xf32> -> vector<16x128xf32>
    %c0_15 = arith.constant 0 : index
    %c0_16 = arith.constant 0 : index
    %20 = vector.load %arg7[%c0_15, %c0_16] : memref<16x1xf32, #tpu.memory_space<vmem>>, vector<16x1xf32>
    %21 = vector.broadcast %20 : vector<16x1xf32> to vector<16x128xf32>
    %22 = arith.addf %19, %21 : vector<16x128xf32>
    %cst_17 = arith.constant 0.000000e+00 : f32
    %23 = vector.broadcast %cst_17 : f32 to vector<16x128xf32>
    %24 = arith.maximumf %22, %23 : vector<16x128xf32>
    %25 = arith.truncf %24 : vector<16x128xf32> to vector<16x128xbf16>
    %c0_18 = arith.constant 0 : index
    %c0_19 = arith.constant 0 : index
    %26 = vector.load %arg8[%c0_18, %c0_19] : memref<1x16xbf16, #tpu.memory_space<vmem>>, vector<1x16xbf16>
    %cst_20 = arith.constant dense<0.000000e+00> : vector<1x128xf32>
    %27 = tpu.matmul %26, %25, %cst_20 {dimension_numbers = #tpu.dot_dimension_numbers<[1], [0], [0], [1], [0, 0, 1, 1], [], []>} : vector<1x16xbf16>, vector<16x128xbf16>, vector<1x128xf32> -> vector<1x128xf32>
    %c0_21 = arith.constant 0 : index
    %c0_22 = arith.constant 0 : index
    %28 = vector.load %arg9[%c0_21, %c0_22] : memref<1x1xf32, #tpu.memory_space<vmem>>, vector<1x1xf32>
    %29 = vector.broadcast %28 : vector<1x1xf32> to vector<1x128xf32>
    %30 = arith.addf %27, %29 : vector<1x128xf32>
    %31 = math.absf %30 : vector<1x128xf32>
    %cst_23 = arith.constant 0.000000e+00 : f32
    %32 = vector.broadcast %cst_23 : f32 to vector<1x128xf32>
    %33 = arith.subf %32, %31 : vector<1x128xf32>
    %34 = math.exp %33 : vector<1x128xf32>
    %cst_24 = arith.constant 0.000000e+00 : f32
    %35 = vector.broadcast %cst_24 : f32 to vector<1x128xf32>
    %36 = arith.cmpf oge, %30, %35 : vector<1x128xf32>
    %cst_25 = arith.constant 1.000000e+00 : f32
    %37 = vector.broadcast %cst_25 : f32 to vector<1x128xf32>
    %38 = arith.addf %37, %34 : vector<1x128xf32>
    %cst_26 = arith.constant 1.000000e+00 : f32
    %39 = vector.broadcast %cst_26 : f32 to vector<1x128xf32>
    %40 = arith.divf %39, %38 : vector<1x128xf32>
    %cst_27 = arith.constant 1.000000e+00 : f32
    %41 = vector.broadcast %cst_27 : f32 to vector<1x128xf32>
    %42 = arith.addf %41, %34 : vector<1x128xf32>
    %43 = arith.divf %34, %42 : vector<1x128xf32>
    %44 = arith.select %36, %40, %43 : vector<1x128xi1>, vector<1x128xf32>
    %c0_28 = arith.constant 0 : index
    %c0_29 = arith.constant 0 : index
    %45 = vector.load %arg10[%c0_28, %c0_29] : memref<1x128xf32, #tpu.memory_space<vmem>>, vector<1x128xf32>
    tpu.vector_store %arg10[%c0_28, %c0_29], %44 {strides = array<i32>} : memref<1x128xf32, #tpu.memory_space<vmem>>, vector<1x128xf32>,
    return
  }
  func.func @transform_0(%arg0: i32) -> (i32, i32) {
    %c0_i32 = arith.constant 0 : i32
    %c0_i32_0 = arith.constant 0 : i32
    return %arg0, %c0_i32 : i32, i32
  }
  func.func @transform_1(%arg0: i32) -> (i32, i32) {
    %c0_i32 = arith.constant 0 : i32
    %c0_i32_0 = arith.constant 0 : i32
    %c0_i32_1 = arith.constant 0 : i32
    return %c0_i32, %c0_i32_0 : i32, i32
  }
  func.func @transform_2(%arg0: i32) -> (i32, i32) {
    %c0_i32 = arith.constant 0 : i32
    %c0_i32_0 = arith.constant 0 : i32
    %c0_i32_1 = arith.constant 0 : i32
    return %c0_i32, %c0_i32_0 : i32, i32
  }
  func.func @transform_3(%arg0: i32) -> (i32, i32) {
    %c0_i32 = arith.constant 0 : i32
    %c0_i32_0 = arith.constant 0 : i32
    %c0_i32_1 = arith.constant 0 : i32
    return %c0_i32, %c0_i32_0 : i32, i32
  }
  func.func @transform_4(%arg0: i32) -> (i32, i32) {
    %c0_i32 = arith.constant 0 : i32
    %c0_i32_0 = arith.constant 0 : i32
    %c0_i32_1 = arith.constant 0 : i32
    return %c0_i32, %c0_i32_0 : i32, i32
  }
  func.func @transform_5(%arg0: i32) -> (i32, i32) {
    %c0_i32 = arith.constant 0 : i32
    %c0_i32_0 = arith.constant 0 : i32
    %c0_i32_1 = arith.constant 0 : i32
    return %c0_i32, %c0_i32_0 : i32, i32
  }
  func.func @transform_6(%arg0: i32) -> (i32, i32) {
    %c0_i32 = arith.constant 0 : i32
    %c0_i32_0 = arith.constant 0 : i32
    %c0_i32_1 = arith.constant 0 : i32
    return %c0_i32, %c0_i32_0 : i32, i32
  }
  func.func @transform_7(%arg0: i32) -> (i32, i32) {
    %c0_i32 = arith.constant 0 : i32
    %c0_i32_0 = arith.constant 0 : i32
    %c0_i32_1 = arith.constant 0 : i32
    return %c0_i32, %c0_i32_0 : i32, i32
  }
  func.func @transform_8(%arg0: i32) -> (i32, i32) {
    %c0_i32 = arith.constant 0 : i32
    %c0_i32_0 = arith.constant 0 : i32
    %c0_i32_1 = arith.constant 0 : i32
    return %c0_i32, %c0_i32_0 : i32, i32
  }
  func.func @transform_9(%arg0: i32) -> (i32, i32) {
    %c0_i32 = arith.constant 0 : i32
    %c0_i32_0 = arith.constant 0 : i32
    return %c0_i32, %arg0 : i32, i32
  }
}

</mosaic_0001>

<bundles_post_ra>
// kernel: tpu_custom_call.1
= control target key start
LH: loop header
LB: loop body
LE: loop exit
PB: predicated region body
PF: predicated region fallthrough
CT: control target
= control target key end

     0   :  { %s841_s0 = inlined_call_operand.vmem [shape: f32[128,32], index: 0, kind: input, shape index: {}]   ;;  %s842_s1 = inlined_call_operand.vmem [shape: bf16[64,32], index: 1, kind: input, shape index: {}]   ;;  %s843_s2 = inlined_call_operand.vmem [shape: f32[64,1], index: 2, kind: input, shape index: {}]   ;;  %s844_s3 = inlined_call_operand.vmem [shape: bf16[32,64], index: 3, kind: input, shape index: {}]   ;;  %s845_s4 = inlined_call_operand.vmem [shape: f32[32,1], index: 4, kind: input, shape index: {}]   ;;  %s846_s5 = inlined_call_operand.vmem [shape: bf16[16,32], index: 5, kind: input, shape index: {}]   ;;  %s847_s6 = inlined_call_operand.vmem [shape: f32[16,1], index: 6, kind: input, shape index: {}]   ;;  %s848_s7 = inlined_call_operand.vmem [shape: bf16[1,16], index: 7, kind: input, shape index: {}]   ;;  %s849_s8 = inlined_call_operand.<no memory space> [shape: f32[1,1], index: 8, kind: input, shape index: {}]   ;;  %s850_s9 = inlined_call_operand.hbm [shape: f32[1,128], index: 9, kind: output, shape index: {}]  }
   0x1   :  { %v14_v0 = vstv %s849_s8 }
   0x2   :  { %15 = vst [vmem:[#allocation2] sm:$0x1] %v14_v0 }
   0x3   :  { %v36_v1 = vld [vmem:[%s841_s0] sm:$0xff]  ;;  %v37_v2 = vld [vmem:[%s841_s0 + $0x8] sm:$0xff]  ;;  %vm136_vm0 = vcmask 261120   ;;  %v38_v3 = vld [vmem:[%s841_s0 + $0x10] sm:$0xff]  ;;  %v633_v6 = vmov 0  }
   0x4   :  { %v52_v4 = vpack.c.bf16 %v37_v2, %v36_v1  ;;  %v39_v5 = vld [vmem:[%s841_s0 + $0x18] sm:$0xff]  ;;  %596 = vset.pattern.permute.xlu0 %v633_v6  ;;  %597 = vset.pattern.permute.xlu1 %v633_v6  ;;  %v40_v9 = vld [vmem:[%s841_s0 + $0x20] sm:$0xff]  ;;  %v41_v10 = vld [vmem:[%s841_s0 + $0x28] sm:$0xff] }
   0x5   :  { %v53_v7 = vpack.c.bf16 %v39_v5, %v38_v3  ;;  %v598_v11 = vld [vmem:[%s842_s1] sm:$0xff]   ;;  %v54_v13 = vpack.c.bf16 %v41_v10, %v40_v9  ;;  %v70_v15 = vld [vmem:[%s843_s2 + $0x10] sm:$0xff]  ;;  %v69_v16 = vld [vmem:[%s843_s2 + $0x8] sm:$0xff] }
   0x6   :  { %584 = vmatprep.subr.msk.bf16.mxu0 %vm136_vm0, %v52_v4  ;;  %v150_v8 = vsel %vm136_vm0, %v52_v4, 0  ;;  %550 = vmatprep.mubr.msk.bf16.mxu0 %vm136_vm0, %v598_v11  ;;  %v68_v14 = vld [vmem:[%s843_s2] sm:$0xff]  ;;  %v71_v17 = vld [vmem:[%s843_s2 + $0x18] sm:$0xff]  ;;  %v42_v18 = vld [vmem:[%s841_s0 + $0x30] sm:$0xff] }
   0x7   :  { %535 = vmatpush3.bf16.xpose.msra.mxu0 %v150_v8  ;;  %v153_v12 = vsel %vm136_vm0, %v53_v7, 0  ;;  %78 = vperm.xlu0 %596, %v68_v14   ;;  %v43_v19 = vld [vmem:[%s841_s0 + $0x38] sm:$0xff]  ;;  %v72_v20 = vld [vmem:[%s843_s2 + $0x20] sm:$0xff]  ;;  %v73_v21 = vld [vmem:[%s843_s2 + $0x28] sm:$0xff] }
   0x8   :  { %585 = vmatprep.subr.msk.bf16.mxu0 %vm136_vm0, %v53_v7  ;;  %88 = vperm.xlu1 %597, %v70_v15  }
   0xb   :  { %83 = vperm.xlu0 %596, %v69_v16  }
   0xc   :  { %93 = vperm.xlu1 %597, %v71_v17  }
   0xf   :  { %537 = vmatpush3.bf16.xpose.msra.mxu0 %v153_v12 }
  0x10   :  { %586 = vmatprep.subr.msk.bf16.mxu0 %vm136_vm0, %v54_v13 }
  0x11   :  { %16 = vsyncpa [#allocation4], 0  ;;  %v156_v22 = vsel %vm136_vm0, %v54_v13, 0  ;;  %v55_v23 = vpack.c.bf16 %v43_v19, %v42_v18  ;;  %98 = vperm.xlu0 %596, %v72_v20   ;;  %v74_v24 = vld [vmem:[%s843_s2 + $0x30] sm:$0xff]  ;;  %103 = vperm.xlu1 %597, %v73_v21   ;;  %v75_v25 = vld [vmem:[%s843_s2 + $0x38] sm:$0xff]  ;;  %vm288_vm1 = vcmask 523264  }
  0x12   :  { %v44_v26 = vld [vmem:[%s841_s0 + $0x40] sm:$0xff]  ;;  %v45_v27 = vld [vmem:[%s841_s0 + $0x48] sm:$0xff]  ;;  %v256_v32 = vld [vmem:[%s845_s4 + $0x10] sm:$0xff]  ;;  %vm635_vm2 = vmmov 0   ;;  %vm427_vm3 = vcmask 130048  }
  0x13   :  { %v254_v28 = vld [vmem:[%s845_s4] sm:$0xff]  ;;  %v255_v29 = vld [vmem:[%s845_s4 + $0x8] sm:$0xff]  ;;  %v159_v30 = vsel %vm136_vm0, %v55_v23, 0  ;;  %v56_v31 = vpack.c.bf16 %v45_v27, %v44_v26  ;;  %v257_v33 = vld [vmem:[%s845_s4 + $0x18] sm:$0xff]  ;;  %v634_v27 = vmov 0.0  }
  0x14   :  { %v46_v34 = vld [vmem:[%s841_s0 + $0x50] sm:$0xff]  ;;  %v47_v35 = vld [vmem:[%s841_s0 + $0x58] sm:$0xff]  ;;  %v352_v36 = vld [vmem:[%s847_s6] sm:$0xff] }
  0x15   :  { %108 = vperm.xlu0 %596, %v74_v24   ;;  %113 = vperm.xlu1 %597, %v75_v25   ;;  %v353_v37 = vld [vmem:[%s847_s6 + $0x8] sm:$0xff]  ;;  %v162_v38 = vsel %vm136_vm0, %v56_v31, 0  ;;  %v57_v39 = vpack.c.bf16 %v47_v35, %v46_v34  ;;  %v417_v40 = vld [vmem:[#allocation2] sm:$0x1]  ;;  %v50_v45 = vld [vmem:[%s841_s0 + $0x70] sm:$0xff] }
  0x16   :  { %v48_v41 = vld [vmem:[%s841_s0 + $0x60] sm:$0xff]  ;;  %v49_v42 = vld [vmem:[%s841_s0 + $0x68] sm:$0xff]  ;;  %v51_v46 = vld [vmem:[%s841_s0 + $0x78] sm:$0xff] }
  0x17   :  { %539 = vmatpush3.bf16.xpose.msra.mxu0 %v156_v22  ;;  %v165_v43 = vsel %vm136_vm0, %v57_v39, 0  ;;  %v58_v44 = vpack.c.bf16 %v49_v42, %v48_v41  ;;  %v59_v48 = vpack.c.bf16 %v51_v46, %v50_v45  ;;  %v599_v50 = vld [vmem:[%s842_s1 + $0x8] sm:$0xff]   ;;  %v600_v51 = vld [vmem:[%s842_s1 + $0x10] sm:$0xff]   ;;  %v601_v52 = vld [vmem:[%s842_s1 + $0x18] sm:$0xff]  }
  0x18   :  { %587 = vmatprep.subr.msk.bf16.mxu0 %vm136_vm0, %v55_v23  ;;  %v602_v53 = vld [vmem:[%s844_s3] sm:$0xff]   ;;  %v603_v26 = vld [vmem:[%s844_s3 + $0x8] sm:$0xff]  }
  0x19   :  { %260 = vperm.xlu0 %596, %v254_v28   ;;  %265 = vperm.xlu1 %597, %v255_v29   ;;  %v168_v47 = vsel %vm136_vm0, %v58_v44, 0  ;;  %v171_v49 = vsel %vm136_vm0, %v59_v48, 0  ;;  %v604_v46 = vld [vmem:[%s846_s5] sm:$0xff]  }
  0x1a   :  { %566 = vmatprep.mubr.msk.bf16.mxu1 %vm288_vm1, %v602_v53 }
  0x1d   :  { %270 = vperm.xlu0 %596, %v256_v32   ;;  %275 = vperm.xlu1 %597, %v257_v33  }
  0x1f   :  { %541 = vmatpush3.bf16.xpose.msra.mxu0 %v159_v30 }
  0x20   :  { %588 = vmatprep.subr.msk.bf16.mxu0 %vm136_vm0, %v56_v31 }
  0x21   :  { %356 = vperm.xlu0 %596, %v352_v36   ;;  %361 = vperm.xlu1 %597, %v353_v37  }
  0x25   :  { %420 = vperm.xlu0 %596, %v417_v40  }
  0x27   :  { %543 = vmatpush3.bf16.xpose.msra.mxu0 %v162_v38 }
  0x28   :  { %589 = vmatprep.subr.msk.bf16.mxu0 %vm136_vm0, %v57_v39 }
  0x2f   :  { %545 = vmatpush3.bf16.xpose.msra.mxu0 %v165_v43 }
  0x30   :  { %590 = vmatprep.subr.msk.bf16.mxu0 %vm136_vm0, %v58_v44 }
  0x37   :  { %547 = vmatpush3.bf16.xpose.msra.mxu0 %v168_v47 }
  0x38   :  { %591 = vmatprep.subr.msk.bf16.mxu0 %vm136_vm0, %v59_v48 }
  0x3f   :  { %549 = vmatpush3.bf16.xpose.msra.mxu0 %v171_v49 }
  0x46   :  { %551 = vmatmul.mubr.msk.bf16.vlgmr.msra.gmra.mrb[0].mxu0 %vm136_vm0, %v599_v50 }
  0x47   :  { %554 = vmatprep.mubr.msk.bf16.mxu0 %vm136_vm0, %v600_v51 }
  0x4e   :  { %555 = vmatmul.mubr.msk.bf16.gmra.mrb[4].mxu0 %vm136_vm0, %v601_v52 }
  0x86   :  { %v79_v54 = vpop.permute.xlu0 %78 }
  0x87   :  { %v89_v55 = vpop.permute.xlu1 %88 }
  0x8a   :  { %v84_v56 = vpop.permute.xlu0 %83 }
  0x8b   :  { %v94_v57 = vpop.permute.xlu1 %93 }
  0x90   :  { %v99_v61 = vpop.permute.xlu0 %98  ;;  %v104_v2 = vpop.permute.xlu1 %103 }
  0x94   :  { %v109_v9 = vpop.permute.xlu0 %108  ;;  %v114_v14 = vpop.permute.xlu1 %113 }
  0x98   :  { %v261_v28 = vpop.permute.xlu0 %260  ;;  %v266_v29 = vpop.permute.xlu1 %265 }
  0x9c   :  { %v271_v30 = vpop.permute.xlu0 %270  ;;  %v276_v34 = vpop.permute.xlu1 %275 }
  0xa0   :  { %v357_v47 = vpop.permute.xlu0 %356  ;;  %v362_v51 = vpop.permute.xlu1 %361 }
 0x119   :  { %v552_v58 = vpop.f32.mrb[0].mxu0 }
 0x11a   :  { %v216_v59 = vadd.f32 %v552_v58, %v89_v55  ;;  %v207_v60 = vpop.f32.mrb[1].mxu0  ;;  %v416_v58 = vld [vmem:[%s848_s7] sm:$0x1]  ;;  %s636_s7 = smov [#allocation3]  }
 0x11b   :  { %v208_v62 = vadd.f32 %v207_v60, %v79_v54  ;;  %v553_v63 = vpop.f32.mrb[2].mxu0  ;;  %s488_s13 = sshll.u32 %s636_s7, 4  ;;  %s489_s13 = int_to_ptr.vmem [resolvable:$true] %s488_s13 }
 0x11c   :  { %v219_v0 = vadd.f32 %v553_v63, %v94_v57  ;;  %v210_v1 = vpop.f32.mrb[3].mxu0  ;;  %v240_v4 = vmax.f32 %v216_v59, 0.0  ;;  %v423_v59 = vlaneseq  ;;  %s609_s14 = scalar_lea.vmem %s489_s13, 16  ;;  %s613_s15 = scalar_lea.vmem %s489_s13, 32 }
 0x11d   :  { %v211_v3 = vadd.f32 %v210_v1, %v84_v56  ;;  %v238_v6 = vmax.f32 %v208_v62, 0.0  ;;  %v421_v62 = vpop.permute.xlu0 %420  ;;  %p610_p0 = scmp.ne.s32.totalorder %s489_s13, %s609_s14  ;;  %p614_p1 = scmp.lt.s32.totalorder %s489_s13, %s489_s13 }
 0x11e   :  { %v241_v5 = vmax.f32 %v219_v0, 0.0  ;;  %v424_v60 = vshrl.u32 %v423_v59, 7  ;;  %p615_p2 = scmp.lt.s32.totalorder %s613_s15, %s609_s14 }
 0x11f   :  { %v239_v7 = vmax.f32 %v211_v3, 0.0 }
 0x120   :  { %v247_v8 = vpack.c.bf16 %v241_v5, %v240_v4  ;;  %p616_p3 = por %p615_p2, %p614_p1 }
 0x121   :  { %v556_v10 = vpop.f32.mrb[4].mxu0  ;;  %v246_v11 = vpack.c.bf16 %v239_v7, %v238_v6 }
 0x122   :  { %v232_v12 = vadd.f32 %v556_v10, %v109_v9  ;;  %v223_v13 = vpop.f32.mrb[5].mxu0  ;;  %p617_p4 = pnand %p616_p3, %p610_p0 }
 0x123   :  { %v224_v15 = vadd.f32 %v223_v13, %v99_v61  ;;  %v557_v16 = vpop.f32.mrb[6].mxu0  ;;  %558 = vmatprep.subr.bf16.mxu1 %v246_v11  ;;  %v425_v61 = vsub.s32 0, %v424_v60 }
 0x124   :  { %v235_v17 = vadd.f32 %v557_v16, %v114_v14  ;;  %v226_v18 = vpop.f32.mrb[7].mxu0  ;;  %559 = vmatpush3.bf16.msra.mxu1 %v246_v11  ;;  %v244_v20 = vmax.f32 %v232_v12, 0.0 }
 0x125   :  { %v227_v19 = vadd.f32 %v226_v18, %v104_v2  ;;  %560 = vmatprep.subr.bf16.mxu1 %v247_v8  ;;  %v242_v22 = vmax.f32 %v224_v15, 0.0  ;;  %v426_v63 = vrot.slane %v421_v62, %v425_v61 }
 0x126   :  { %v245_v21 = vmax.f32 %v235_v17, 0.0 }
 0x127   :  { %v243_v23 = vmax.f32 %v227_v19, 0.0 }
 0x128   :  { %v249_v24 = vpack.c.bf16 %v245_v21, %v244_v20  ;;  %561 = vmatpush3.bf16.msra.mxu1 %v247_v8 }
 0x129   :  { %v248_v25 = vpack.c.bf16 %v243_v23, %v242_v22 }
 0x12b   :  { %562 = vmatprep.subr.bf16.mxu1 %v248_v25 }
 0x12c   :  { %563 = vmatpush3.bf16.msra.mxu1 %v248_v25 }
 0x12d   :  { %564 = vmatprep.subr.bf16.mxu1 %v249_v24 }
 0x130   :  { %565 = vmatpush3.bf16.msra.mxu1 %v249_v24 }
 0x131   :  { %570 = vmatprep.subr.bf16.mxu1 %v634_v27 }
 0x133   :  { %567 = vmatmul.mubr.msk.bf16.vlgmr.msra.gmra.mrb[0].mxu1 %vm288_vm1, %v603_v26 }
 0x134   :  { %574 = vmatprep.mubr.msk.bf16.mxu1 %vm635_vm2, %v634_v27 }
 0x206   :  { %v568_v31 = vpop.f32.mrb[0].mxu1 }
 0x207   :  { %v338_v32 = vadd.f32 %v568_v31, %v271_v30  ;;  %v329_v33 = vpop.f32.mrb[1].mxu1 }
 0x208   :  { %v330_v35 = vadd.f32 %v329_v33, %v261_v28  ;;  %v569_v36 = vpop.f32.mrb[2].mxu1 }
 0x209   :  { %v341_v37 = vadd.f32 %v569_v36, %v276_v34  ;;  %v332_v38 = vpop.f32.mrb[3].mxu1  ;;  %v346_v40 = vmax.f32 %v338_v32, 0.0 }
 0x20a   :  { %v333_v39 = vadd.f32 %v332_v38, %v266_v29  ;;  %v344_v42 = vmax.f32 %v330_v35, 0.0 }
 0x20b   :  { %v347_v41 = vmax.f32 %v341_v37, 0.0 }
 0x20c   :  { %v345_v43 = vmax.f32 %v333_v39, 0.0 }
 0x20d   :  { %v349_v44 = vpack.c.bf16 %v347_v41, %v346_v40 }
 0x20e   :  { %v348_v45 = vpack.c.bf16 %v345_v43, %v344_v42 }
 0x210   :  { %571 = vmatpush3.bf16.msra.mxu1 %v348_v45 }
 0x211   :  { %572 = vmatprep.subr.bf16.mxu1 %v634_v27 }
 0x214   :  { %573 = vmatpush3.bf16.msra.mxu1 %v349_v44 }
 0x215   :  { %578 = vmatprep.subr.bf16.mxu1 %v634_v27 }
 0x217   :  { %575 = vmatmul.mubr.msk.bf16.vlgmr.msra.gmra.mrb[4].mxu1 %vm136_vm0, %v604_v46 }
 0x218   :  { %580 = vmatprep.mubr.msk.bf16.mxu1 %vm635_vm2, %v634_v27 }
 0x2ea   :  { %v406_v48 = vpop.f32.mrb[4].mxu1 }
 0x2eb   :  { %v407_v49 = vadd.f32 %v406_v48, %v357_v47  ;;  %v576_v50 = vpop.f32.mrb[5].mxu1 }
 0x2ec   :  { %v409_v52 = vpop.f32.mrb[6].mxu1 }
 0x2ed   :  { %v410_v53 = vadd.f32 %v409_v52, %v362_v51  ;;  %v577_v54 = vpop.f32.mrb[7].mxu1  ;;  %v413_v55 = vmax.f32 %v407_v49, 0.0 }
 0x2ef   :  { %v414_v56 = vmax.f32 %v410_v53, 0.0 }
 0x2f1   :  { %v415_v57 = vpack.c.bf16 %v414_v56, %v413_v55 }
 0x2f3   :  { %579 = vmatpush3.bf16.msra.mxu1 %v415_v57 }
 0x2f6   :  { %581 = vmatmul.mubr.msk.bf16.vlgmr.msra.gmra.mrb[8].mxu1 %vm427_vm3, %v416_v58 }
 0x3c9   :  { %v465_v0 = vpop.f32.mrb[8].mxu1 }
 0x3ca   :  { %v466_v1 = vadd.f32 %v465_v0, %v426_v63  ;;  %v582_v2 = vpop.f32.mrb[9].mxu1 }
 0x3cb   :  { %v468_v3 = vpop.f32.mrb[10].mxu1 }
 0x3cc   :  { %v471_v4 = vand.u32 2147483647, %v466_v1  ;;  %v583_v5 = vpop.f32.mrb[11].mxu1  ;;  %vm475_vm4 = vcmp.ge.f32.partialorder %v466_v1, 0.0 }
 0x3ce   :  { %v472_v6 = vsub.f32 0.0, %v471_v4 }
 0x3d0   :  { %v473_v7 = vmul.f32 1.442695, %v472_v6 }
 0x3d2   :  { %605 = vpow2.f32 %v473_v7 }
 0x3dc   :  { %v606_v8 = vpop.eup %605 }
 0x3dd   :  { %v476_v9 = vadd.f32 1.0, %v606_v8 }
 0x3df   :  { %607 = vrcp.f32 %v476_v9 }
 0x3e9   :  { %v608_v10 = vpop.eup %607 }
 0x3ea   :  { %v479_v11 = vmul.f32 %v608_v10, %v606_v8 }
 0x3ec   :  { %v480_v12 = vsel %vm475_vm4, %v608_v10, %v479_v11 }
 0x3ed   :  { %481 = vst [vmem:[#allocation3] sm:$0x1] %v480_v12 }
 0x3ee   :  { %620 = shalt.err (!%p617_p4)
}
 0x3ef   :  { %s621_s18 = scalar_lea.hbm %s850_s9, 16 }
 0x3f0   :  { %p622_p5 = scmp.ne.s32.totalorder %s850_s9, %s621_s18  ;;  %p625_p6 = scmp.lt.u32.totalorder %s621_s18, %s850_s9 }
 0x3f2   :  { %p627_p7 = pnand %p625_p6, %p622_p5 }
 0x3f4   :  { %630 = shalt.err (!%p627_p7)
}
 0x3f5   :  { %491 = dma.vmem_to_hbm [thread:$0]  %s489_s13, 16, %s850_s9, [#allocation4]  }
 0x3f6   :  { %631 = dma.done.wait [#allocation4], 16  }
 0x3f7   :  { %632 = vsyncadd [#allocation4], 4294967280 }
 0x3f8   :  { %495 = vsyncpa [#allocation4], 1 }

</bundles_post_ra>
